<compile_context>
chip_gen: v7x
topology: tpu7x:2x2x1
jax: 0.10.0
libtpu: 0.0.40
codegen_flags: <defaults>
</compile_context>

<pallas_src>
import functools

import jax
import jax.numpy as jnp
from jax.experimental import pallas as pl
from jax.experimental.pallas import tpu as pltpu


def _shared_mlp_kernel(w_ref, shift_ref, x_ref, o_ref, *, use_relu):
    # w_ref:     (Cout, Cin)   folded weight (BN scale pre-multiplied)
    # shift_ref: (Cout, 1)     folded bias + BN shift
    # x_ref:     (1, Cin, tn)  NK on the lane dim
    # o_ref:     (1, Cout, tn)
    y = jnp.dot(w_ref[...], x_ref[0], preferred_element_type=jnp.float32)
    y = y + shift_ref[...]          # f32 epilogue on the MXU accumulator
    if use_relu:
        y = jnp.maximum(y, 0.0)
    o_ref[0] = y.astype(o_ref.dtype)


def _pick_lane_tile(nk, cin, cout, itemsize, budget_bytes=20 << 20):
    """Largest lane tile whose double-buffered working set fits the budget."""
    def working_set(t):
        # double-buffered x + out tiles, plus the resident weight
        return 2 * t * (cin + cout) * itemsize + cin * cout * itemsize

    if working_set(nk) <= budget_bytes:
        return nk  # one lane tile covers the whole row (full-dim block is legal)
    tn = 2048
    while tn > 128 and working_set(tn) > budget_bytes:
        tn //= 2
    return tn


def shared_mlp_forward(x_nchw, weight, bias, bn_params=None, activation="relu",
                       io_dtype=jnp.float32):
    """SharedMLP forward.

    x_nchw: (B, Cin, N, K). weight: (Cout, Cin) [Conv2d 1x1]. bias: (Cout,).
    bn_params: optional (gamma, beta, running_mean, running_var, eps).
    activation: None or "relu".
    io_dtype: dtype for the HBM round-trip of activations (keep f32 for exact
              parity with the PyTorch module; bf16 halves HBM traffic on this
              memory-bound op with f32 MXU accumulation preserved).
    """
    if activation not in (None, "relu"):
        raise ValueError(f"unsupported activation: {activation!r}")

    B, Cin, N, K = x_nchw.shape
    Cout = weight.shape[0]
    NK = N * K

    # ---- Fold bias + (eval-mode) BatchNorm into weight / shift ----------------
    w_f32 = weight.astype(jnp.float32)                       # (Cout, Cin)
    b_f32 = bias.astype(jnp.float32)                         # (Cout,)
    if bn_params is not None:
        gamma, beta, running_mean, running_var, eps = bn_params
        scale = gamma.astype(jnp.float32) / jnp.sqrt(
            running_var.astype(jnp.float32) + eps)            # (Cout,)
        w_fold = w_f32 * scale[:, None]
        shift = scale * b_f32 + beta.astype(jnp.float32) - scale * running_mean
    else:
        w_fold = w_f32
        shift = b_f32
    shift = shift.reshape(Cout, 1).astype(jnp.float32)

    # ---- Native-layout view: (B, Cin, NK); no transposes ----------------------
    x3d = x_nchw.reshape(B, Cin, NK).astype(io_dtype)
    itemsize = jnp.dtype(io_dtype).itemsize

    tn = _pick_lane_tile(NK, Cin, Cout, itemsize)
    grid = (B, pl.cdiv(NK, tn))

    # Scoped-VMEM ceiling: enough for the tiles + headroom, safe on v5e/v6e/v7x.
    vmem_limit = 32 * 1024 * 1024

    kernel = functools.partial(_shared_mlp_kernel, use_relu=(activation == "relu"))

    out3d = pl.pallas_call(
        kernel,
        out_shape=jax.ShapeDtypeStruct((B, Cout, NK), io_dtype),
        grid_spec=pltpu.PrefetchScalarGridSpec(
            num_scalar_prefetch=0,
            grid=grid,
            in_specs=[
                pl.BlockSpec((Cout, Cin), lambda b, j: (0, 0)),    # folded weight
                pl.BlockSpec((Cout, 1), lambda b, j: (0, 0)),      # folded shift
                pl.BlockSpec((1, Cin, tn), lambda b, j: (b, 0, j)),  # x tile
            ],
            out_specs=pl.BlockSpec((1, Cout, tn), lambda b, j: (b, 0, j)),
        ),
        compiler_params=pltpu.CompilerParams(
            dimension_semantics=("parallel", "parallel"),
            vmem_limit_bytes=vmem_limit,
        ),
    )(w_fold, shift, x3d)

    # Free reshape (contiguous) back to NCHW.
    return out3d.reshape(B, Cout, N, K)


def _reference(x_nchw, weight, bias, bn_params, activation):
    # Plain-JAX reference for correctness check.
    y = jnp.einsum("bcnk,oc->bonk", x_nchw, weight) + bias[None, :, None, None]
    if bn_params is not None:
        gamma, beta, rm, rv, eps = bn_params
        y = (y - rm[None, :, None, None]) / jnp.sqrt(rv[None, :, None, None] + eps)
        y = y * gamma[None, :, None, None] + beta[None, :, None, None]
    if activation == "relu":
        y = jnp.maximum(y, 0.0)
    return y


if __name__ == "__main__":
    key = jax.random.PRNGKey(0)
    k_x, k_w, k_b, k_g, k_be, k_rm, k_rv = jax.random.split(key, 7)

    B, Cin, Cout, N, K = 2, 4, 8, 16, 16          # input (B, d_in, N, K)
    x = jax.random.normal(k_x, (B, Cin, N, K), jnp.float32)

    # Conv2d 1x1 parameters -> weight (Cout, Cin), bias (Cout,)
    weight = 0.1 * jax.random.normal(k_w, (Cout, Cin), jnp.float32)
    bias = 0.1 * jax.random.normal(k_b, (Cout,), jnp.float32)

    # BatchNorm2d(eps=1e-6) params, inference (running-stats) mode
    gamma = 1.0 + 0.05 * jax.random.normal(k_g, (Cout,), jnp.float32)
    beta = 0.05 * jax.random.normal(k_be, (Cout,), jnp.float32)
    running_mean = 0.1 * jax.random.normal(k_rm, (Cout,), jnp.float32)
    running_var = 1.0 + 0.1 * jax.random.uniform(k_rv, (Cout,), jnp.float32)
    bn_params = (gamma, beta, running_mean, running_var, 1e-6)

    out = shared_mlp_forward(x, weight, bias, bn_params=bn_params,
                             activation="relu")
    out = jax.block_until_ready(out)

    ref = _reference(x, weight, bias, bn_params, "relu")
    assert out.shape == (B, Cout, N, K)
    assert jnp.allclose(out, ref, atol=1e-4, rtol=1e-4)

    # Also exercise the no-BN / no-activation path.
    out2 = jax.block_until_ready(
        shared_mlp_forward(x, weight, bias, bn_params=None, activation=None))
    ref2 = _reference(x, weight, bias, None, None)
    assert jnp.allclose(out2, ref2, atol=1e-4, rtol=1e-4)

    print("KERNEL_OK")
</pallas_src>

<mosaic_0001>
module attributes {stable_mosaic.version = 11 : i64} {
  func.func @_shared_mlp_kernel(%arg0: i32, %arg1: i32, %arg2: memref<8x4xf32, #tpu.memory_space<vmem>>, %arg3: memref<8x1xf32, #tpu.memory_space<vmem>>, %arg4: memref<1x4x256xf32, #tpu.memory_space<vmem>>, %arg5: memref<1x8x256xf32, #tpu.memory_space<vmem>>) attributes {dimension_semantics = [#tpu.dimension_semantics<parallel>, #tpu.dimension_semantics<parallel>], iteration_bounds = array<i64: 2, 1>, scalar_prefetch = 0 : i64, scratch_operands = 0 : i64, tpu.core_type = #tpu.core_type<tc>, window_params = [{pipeline_mode = #tpu.pipeline_mode<synchronous>, transform_indices = @transform_0, window_bounds = array<i64: 8, 4>}, {pipeline_mode = #tpu.pipeline_mode<synchronous>, transform_indices = @transform_1, window_bounds = array<i64: 8, 1>}, {transform_indices = @transform_2, window_bounds = array<i64: 1, 4, 256>}, {transform_indices = @transform_3, window_bounds = array<i64: 1, 8, 256>}]} {
    %c0 = arith.constant 0 : index
    %c0_0 = arith.constant 0 : index
    %0 = vector.load %arg2[%c0, %c0_0] : memref<8x4xf32, #tpu.memory_space<vmem>>, vector<8x4xf32>
    %c0_1 = arith.constant 0 : index
    %c0_2 = arith.constant 0 : index
    %c0_3 = arith.constant 0 : index
    %1 = vector.load %arg4[%c0_1, %c0_2, %c0_3] : memref<1x4x256xf32, #tpu.memory_space<vmem>>, vector<1x4x256xf32>
    %2 = vector.shape_cast %1 : vector<1x4x256xf32> to vector<4x256xf32>
    %cst = arith.constant dense<0.000000e+00> : vector<8x256xf32>
    %3 = tpu.matmul %0, %2, %cst {dimension_numbers = #tpu.dot_dimension_numbers<[1], [0], [0], [1], [0, 0, 1, 1], [], []>} : vector<8x4xf32>, vector<4x256xf32>, vector<8x256xf32> -> vector<8x256xf32>
    %c0_4 = arith.constant 0 : index
    %c0_5 = arith.constant 0 : index
    %4 = vector.load %arg3[%c0_4, %c0_5] : memref<8x1xf32, #tpu.memory_space<vmem>>, vector<8x1xf32>
    %5 = vector.broadcast %4 : vector<8x1xf32> to vector<8x256xf32>
    %6 = arith.addf %3, %5 : vector<8x256xf32>
    %cst_6 = arith.constant 0.000000e+00 : f32
    %7 = vector.broadcast %cst_6 : f32 to vector<8x256xf32>
    %8 = arith.maximumf %6, %7 : vector<8x256xf32>
    %c0_7 = arith.constant 0 : index
    %c0_8 = arith.constant 0 : index
    %c0_9 = arith.constant 0 : index
    %9 = vector.load %arg5[%c0_7, %c0_8, %c0_9] : memref<1x8x256xf32, #tpu.memory_space<vmem>>, vector<1x8x256xf32>
    %10 = vector.shape_cast %9 : vector<1x8x256xf32> to vector<8x256xf32>
    %11 = vector.shape_cast %8 : vector<8x256xf32> to vector<1x8x256xf32>
    tpu.vector_store %arg5[%c0_7, %c0_8, %c0_9], %11 {strides = array<i32>} : memref<1x8x256xf32, #tpu.memory_space<vmem>>, vector<1x8x256xf32>,
    return
  }
  func.func @transform_0(%arg0: i32, %arg1: i32) -> (i32, i32) {
    %c0_i32 = arith.constant 0 : i32
    %c0_i32_0 = arith.constant 0 : i32
    %c0_i32_1 = arith.constant 0 : i32
    return %c0_i32, %c0_i32_0 : i32, i32
  }
  func.func @transform_1(%arg0: i32, %arg1: i32) -> (i32, i32) {
    %c0_i32 = arith.constant 0 : i32
    %c0_i32_0 = arith.constant 0 : i32
    %c0_i32_1 = arith.constant 0 : i32
    return %c0_i32, %c0_i32_0 : i32, i32
  }
  func.func @transform_2(%arg0: i32, %arg1: i32) -> (i32, i32, i32) {
    %c0_i32 = arith.constant 0 : i32
    %c0_i32_0 = arith.constant 0 : i32
    return %arg0, %c0_i32, %arg1 : i32, i32, i32
  }
  func.func @transform_3(%arg0: i32, %arg1: i32) -> (i32, i32, i32) {
    %c0_i32 = arith.constant 0 : i32
    %c0_i32_0 = arith.constant 0 : i32
    return %arg0, %c0_i32, %arg1 : i32, i32, i32
  }
}

</mosaic_0001>

<bundles_post_ra>
// kernel: tpu_custom_call.1
= control target key start
LH: loop header
LB: loop body
LE: loop exit
PB: predicated region body
PF: predicated region fallthrough
CT: control target
= control target key end

     0   :  { %8 = vsyncpa [#allocation3], 0  ;;  %s685_s0 = inlined_call_operand.vmem [shape: f32[8,4], index: 0, kind: input, shape index: {}]   ;;  %s686_s1 = inlined_call_operand.vmem [shape: f32[8,1], index: 1, kind: input, shape index: {}]   ;;  %s687_s2 = inlined_call_operand.vmem [shape: f32[2,4,256], index: 2, kind: input, shape index: {}]   ;;  %s688_s3 = inlined_call_operand.hbm [shape: f32[2,8,256], index: 3, kind: output, shape index: {}]  }
   0x1   :  { %10 = vsyncpa [#allocation3 + $0x1], 0  ;;  %s567_s12 = smov 0   ;;  %s569_s13 = smov 0  }
   0x2   :  { %s571_s14 = smov 0   ;;  %s573_s15 = smov 0  }
   0x3   :  { %s575_s16 = smov 0   ;;  %s577_s17 = smov 0  }
   0x4 LB: > { %s387_s18 = sadd.s32 4294967295, %s542_s17   ;;  %s388_s19 = sadd.s32 4294967294, %s542_s17   ;;  %s542_s17 = sphi %s577_s17, %s16_s17   ;;  %s538_s16 = sphi %s575_s16, %s695_s16   ;;  %s534_s15 = sphi %s573_s15, %s694_s15   ;;  %s530_s14 = sphi %s571_s14, %s693_s14   ;;  %s526_s13 = sphi %s569_s13, %s692_s13   ;;  %s522_s12 = sphi %s567_s12, %s691_s12  }
   0x5   : > { %s28_s20 = sadd.s32 1, %s538_s16  ;;  %s107_s21 = sadd.s32 1, %s530_s14 }
   0x6   : > { %p30_p0 = scmp.ge.s32.totalorder %s28_s20, 2  ;;  %p117_p1 = scmp.ne.s32.totalorder %s530_s14, %s526_s13 }
   0x7   : > { %p118_p2 = scmp.eq.s32.totalorder %s387_s18, 1  ;;  %p123_p3 = scmp.ne.s32.totalorder %s526_s13, %s522_s12 }
   0x8   : > { %s697_s20 = smov (%p30_p0, %s28_s20), 0  ;;  %p124_p5 = scmp.eq.s32.totalorder %s388_s19, 1 }
   0x9   : > { %p607_p4 = por %p118_p2, %p117_p1  ;;  %s102_s23 = ssub.s32 %s538_s16, %s697_s20 }
   0xa   : > { %p391_p6 = scmp.ge.s32.totalorder %s542_s17, 1  ;;  %p105_p7 = scmp.eq.s32.totalorder %s102_s23, 0 }
   0xb   : > { %p614_p8 = por %p124_p5, %p123_p3  ;;  %p161_p9 = scmp.lt.s32.totalorder %s542_s17, 3 }
   0xc   : > { %s620_s25 = scalar_select %p105_p7, %s530_s14, %s107_s21  }
   0xd   : > { %p162_p10 = pnand %p391_p6, %p161_p9 }
   0xe   : > { %p190_p11 = scmp.lt.s32.totalorder (!%p162_p10), %s534_s15, 1  ;;  %v544_v0 = vmov (!%p162_p10), 0.0   ;;  %v545_v1 = vmov (!%p162_p10), 0   ;;  %v202_v2 = vld [vmem:[%s686_s1] sm:$0xff] (!%p162_p10)  ;;  %vm214_vm0 = vcmask (!%p162_p10), 1043456   ;;  %vm210_vm1 = vcmask (!%p162_p10), 31744  }
   0xf   : > { %165 = sbr.rel (%p162_p10) target bundleno = 262 (0x106), region = 32  ;;  %283 = vmatprep.mubr.f32.mxu0 (!%p162_p10), %v544_v0  ;;  %462 = vset.pattern.permute.xlu0 (!%p162_p10), %v545_v1  ;;  %v200_v5 = vld [vmem:[%s685_s0] sm:$0xff] (!%p162_p10)  ;;  %s186_s8 = sand.u32 (!%p162_p10), 1, %s526_s13  }
  0x10   : > { %205 = vperm.xlu0 (!%p162_p10), %462, %v202_v2   ;;  %s392_s9 = sshll.u32 (!%p162_p10), %s186_s8, 4  ;;  %s404_s10 = sshll.u32 (!%p162_p10), %s534_s15, 8 }
  0x11   : > { %s188_s11 = scalar_lea.vmem (!%p162_p10), [#allocation2], %s392_s9  ;;  %s638_s23 = scalar_lea.hbm (!%p162_p10), %s688_s3, %s404_s10 }
  0x12   : > { %s311_s18 = sshll.u32 (!%p162_p10), %s188_s11, 4  ;;  %s295_s26 = scalar_lea.sflag (!%p162_p10), [#allocation3], %s186_s8  ;;  %s640_s18 = int_to_ptr.vmem [resolvable:$true] %s311_s18 }
  0x13   : > { %s464_s27 = scalar_lea.vmem (!%p162_p10), %s640_s18, 256 }
  0x14   : > { %p465_p12 = scmp.ne.s32.totalorder (!%p162_p10), %s640_s18, %s464_s27 }
  0x16   : > { %s191_s28 = scalar_select %p190_p11, %s534_s15, 1 }
  0x17   : > { %p466_p13 = pnand %p465_p12, %p607_p4  ;;  %s546_s15 = smov [#allocation2]  }
  0x18   : > { %s403_s29 = sshll.u32 %s191_s28, 3  ;;  %s468_s28 = sshll.u32 %s546_s15, 4  ;;  %s469_s28 = int_to_ptr.vmem [resolvable:$false] %s468_s28 }
  0x19   : > { %s197_s5 = scalar_lea.vmem %s687_s2, %s403_s29  ;;  %p467_p0 = pneg %p466_p13 }
  0x1a   : > { %v201_v3 = vld [vmem:[%s197_s5] sm:$0xff]  ;;  %s470_s29 = scalar_lea.vmem %s469_s28, 512  ;;  %p471_p1 = scmp.lt.s32.totalorder %s640_s18, %s469_s28 }
  0x1b   : > { %v209_v4 = vcombine.high %v201_v3, %v201_v3  ;;  %p472_p2 = scmp.lt.s32.totalorder %s470_s29, %s464_s27 }
  0x1d   : > { %395 = vmatprep.subr.msk.mxu0 %vm214_vm0, %v209_v4  ;;  %p473_p3 = por %p472_p2, %p471_p1 }
  0x1e   : > { %396 = vmatpush1.msk.msra.mxu0 %vm214_vm0, %v201_v3 }
  0x1f   : > { %397 = vmatmul.mubr.msk.f32.vlgmr.msra.gmra.mrb[0].mxu0 %vm210_vm1, %v200_v5  ;;  %p474_p5 = pnand %p473_p3, %p467_p0 }
  0x8f   : > { %v206_v6 = vpop.permute.xlu0 %205 }
  0xf2   : > { %v285_v7 = vpop.f32.mrb[0].mxu0 }
  0xf3   : > { %v286_v8 = vadd.f32 %v285_v7, %v206_v6  ;;  %v287_v9 = vpop.f32.mrb[1].mxu0 }
  0xf4   : > { %v288_v10 = vadd.f32 %v287_v9, %v206_v6 }
  0xf5   : > { %v290_v11 = vmax.f32 %v286_v8, 0.0 }
  0xf6   : > { %v291_v12 = vmax.f32 %v288_v10, 0.0 }
  0xf7   : > { %292 = vst [vmem:[%s188_s11] sm:$0xff] %v290_v11 }
  0xf8   : > { %293 = vst [vmem:[%s188_s11 + $0x8] sm:$0xff] %v291_v12 }
  0xf9   : > { %477 = shalt.err (!%p474_p5)
}
  0xfa   : > { %s478_s30 = scalar_lea.hbm %s638_s23, 256  ;;  %s482_s6 = scalar_lea.hbm %s688_s3, 512 }
  0xfb   : > { %p479_p6 = scmp.ne.s32.totalorder %s638_s23, %s478_s30  ;;  %p483_p10 = scmp.lt.u32.totalorder %s638_s23, %s688_s3 }
  0xfc   : > { %p484_p11 = scmp.lt.u32.totalorder %s482_s6, %s478_s30  ;;  %p486_p13 = scmp.lt.u32.totalorder %s478_s30, %s638_s23 }
  0xfd   : > { %p480_p7 = pnand %p479_p6, %p607_p4 }
  0xfe   : > { %p485_p12 = por %p484_p11, %p483_p10 }
  0xff   : > { %p481_p9 = pneg %p480_p7 }
 0x100   : > { %p487_p0 = por %p486_p13, %p485_p12 }
 0x102   : > { %p488_p1 = pnand %p487_p0, %p481_p9 }
 0x104   : > { %491 = shalt.err (!%p488_p1)
}
 0x105   : > { %405 = dma.vmem_to_hbm [thread:$0]  (%p607_p4), %s640_s18, 256, %s638_s23, %s295_s26  }
 0x106 PF: > { %p411_p2 = scmp.ge.s32.totalorder %s542_s17, 2  ;;  %s323_s9 = sand.u32 1, %s522_s12  }
 0x107   : > { %s324_s10 = scalar_lea.sflag [#allocation3], %s323_s9 }
 0x108   : > { %p408_p3 = pnand %p411_p2, %p614_p8 }
 0x10a   : > { %517 = dma.done.wait (!%p408_p3), %s324_s10, 256  }
 0x10b   : > { %519 = vsyncadd (!%p408_p3), %s324_s10, 4294967040  ;;  %s16_s17 = sadd.s32 1, %s542_s17   ;;  %s691_s12 = smov %s526_s13 }
 0x10c   : > { %p13_p5 = scmp.ge.s32.totalorder %s16_s17, 4   ;;  %s692_s13 = smov %s530_s14 }
 0x10d   : > { %s693_s14 = smov %s620_s25  ;;  %s694_s15 = smov %s538_s16 }
 0x10e   : > { %s695_s16 = smov %s697_s20  ;;  %15 = sbr.rel (!%p13_p5) target bundleno = 4 (0x4), region = 67 }
 0x115   :  { %329 = vsyncpa [#allocation3], 1 }
 0x116   :  { %331 = vsyncpa [#allocation3 + $0x1], 1 }

</bundles_post_ra>
